<compile_context>
chip_gen: v7x
topology: tpu7x:2x2x1
jax: 0.10.0
libtpu: 0.0.40
codegen_flags: <defaults>
</compile_context>

<pallas_src>
import jax
import jax.numpy as jnp
from jax.experimental import pallas as pl
from jax.experimental.pallas import tpu as pltpu


# ---------------------------------------------------------------------------
# Pallas kernel: fused encoder + (policy|value) head, one batch tile per step
# ---------------------------------------------------------------------------
def _base_model_kernel(
    obs_ref,      # [TB, D]        bf16 flattened observation tile
    w_enc_ref,    # [D, HID]       bf16 encoder weight (VMEM-resident)
    b_enc_ref,    # [1, HID]       f32  encoder bias
    w_head_ref,   # [HID, HEADP]   bf16 fused head weight ([pi | v | zeros])
    b_head_ref,   # [1, HEADP]     f32  fused head bias
    latent_ref,   # [TB, HID]      f32  out: encode(obs)
    head_ref,     # [TB, HEADP]    f32  out: fused head (lane-dense)
):
    x = obs_ref[...]                                                  # bf16

    # encode(obs): linear + ReLU (bf16 MXU inputs, f32 accumulate)
    h = jnp.dot(x, w_enc_ref[...], preferred_element_type=jnp.float32)
    h = jnp.maximum(h + b_enc_ref[...], 0.0)
    latent_ref[...] = h

    # fused policy + value head: single 128-lane matmul + unmasked store
    head = jnp.dot(h.astype(jnp.bfloat16), w_head_ref[...],
                   preferred_element_type=jnp.float32)
    head_ref[...] = head + b_head_ref[...]


# ---------------------------------------------------------------------------
# Python wrapper
# ---------------------------------------------------------------------------
def base_model_forward(obs_nchw, params, num_actions, *, tb=128):
    """Fused BaseModel forward pass.

    obs_nchw: [B, C, H, W] float32 (NCHW, PyTorch convention)
    params:   dict from init_params (bf16 fused weights)
    returns:  dict(latent=[B,HID] f32, pi_logits=[B,A] f32, vpred=[B,1] f32)
    """
    B = obs_nchw.shape[0]
    obs_flat = obs_nchw.reshape(B, -1).astype(jnp.bfloat16)   # cast once, DMA bf16
    D = obs_flat.shape[1]
    HID = params["w_enc"].shape[1]
    HEADP = params["w_head"].shape[1]
    A = num_actions

    # Pad batch up to a multiple of the batch tile (sublane/MXU-row friendly).
    n_tiles = pl.cdiv(B, tb)
    B_pad = n_tiles * tb
    if B_pad != B:
        obs_flat = jnp.pad(obs_flat, ((0, B_pad - B), (0, 0)))

    grid_spec = pltpu.PrefetchScalarGridSpec(
        num_scalar_prefetch=0,
        grid=(n_tiles,),
        in_specs=[
            pl.BlockSpec((tb, D), lambda i: (i, 0)),        # obs tile (pipelined)
            pl.BlockSpec((D, HID), lambda i: (0, 0)),       # weights: constant block
            pl.BlockSpec((1, HID), lambda i: (0, 0)),
            pl.BlockSpec((HID, HEADP), lambda i: (0, 0)),
            pl.BlockSpec((1, HEADP), lambda i: (0, 0)),
        ],
        out_specs=[
            pl.BlockSpec((tb, HID), lambda i: (i, 0)),      # lane-dense latent
            pl.BlockSpec((tb, HEADP), lambda i: (i, 0)),    # lane-dense fused head
        ],
    )

    out_shapes = (
        jax.ShapeDtypeStruct((B_pad, HID), jnp.float32),
        jax.ShapeDtypeStruct((B_pad, HEADP), jnp.float32),
    )

    latent_full, head_full = pl.pallas_call(
        _base_model_kernel,
        out_shape=out_shapes,
        grid_spec=grid_spec,
        compiler_params=pltpu.CompilerParams(
            dimension_semantics=("parallel",),              # shard batch tiles (v7x)
        ),
    )(
        obs_flat,
        params["w_enc"], params["b_enc"],
        params["w_head"], params["b_head"],
    )

    # Narrow slicing happens outside the kernel (kernel outputs stay lane-dense).
    latent = latent_full[:B]
    pi_logits = head_full[:B, :A]
    vpred = head_full[:B, A:A + 1]
    return {"latent": latent, "pi_logits": pi_logits, "vpred": vpred}


def init_params(key, obs_dim, hidden_dim, num_actions):
    """Deterministic synthetic init; heads fused into one 128-lane-padded slab."""
    k1, k2, k3 = jax.random.split(key, 3)
    scale_enc = 1.0 / jnp.sqrt(jnp.float32(obs_dim))
    scale_head = 1.0 / jnp.sqrt(jnp.float32(hidden_dim))

    w_enc = jax.random.normal(k1, (obs_dim, hidden_dim), jnp.float32) * scale_enc
    b_enc = jnp.zeros((1, hidden_dim), jnp.float32)
    w_pi = jax.random.normal(k2, (hidden_dim, num_actions), jnp.float32) * scale_head
    b_pi = jnp.zeros((1, num_actions), jnp.float32)
    w_v = jax.random.normal(k3, (hidden_dim, 1), jnp.float32) * scale_head
    b_v = jnp.zeros((1, 1), jnp.float32)

    # Fused head: columns [0:A] = policy, column A = value, rest zero-padded
    # up to a multiple of 128 lanes.
    head_pad = max(128, ((num_actions + 1 + 127) // 128) * 128)
    w_head = jnp.zeros((hidden_dim, head_pad), jnp.float32)
    w_head = w_head.at[:, :num_actions].set(w_pi)
    w_head = w_head.at[:, num_actions:num_actions + 1].set(w_v)
    b_head = jnp.zeros((1, head_pad), jnp.float32)
    b_head = b_head.at[:, :num_actions].set(b_pi)
    b_head = b_head.at[:, num_actions:num_actions + 1].set(b_v)

    return {
        "w_enc": w_enc.astype(jnp.bfloat16),
        "b_enc": b_enc,
        "w_head": w_head.astype(jnp.bfloat16),
        "b_head": b_head,
    }


if __name__ == "__main__":
    # Small shapes consistent with observation_space=Box([C,H,W]),
    # action_space=Discrete(num_actions).
    B, C, H, W = 2, 4, 16, 16
    HIDDEN = 128
    NUM_ACTIONS = 16

    key = jax.random.PRNGKey(0)
    k_obs, k_params = jax.random.split(key)

    obs = jax.random.normal(k_obs, (B, C, H, W), jnp.float32)   # NCHW
    params = init_params(k_params, C * H * W, HIDDEN, NUM_ACTIONS)

    out = base_model_forward(obs, params, NUM_ACTIONS)
    out = jax.block_until_ready(out)

    # Reference in plain JAX using the same bf16-input / f32-accumulate math.
    xb = obs.reshape(B, -1).astype(jnp.bfloat16)
    h_ref = jnp.maximum(
        jnp.dot(xb, params["w_enc"], preferred_element_type=jnp.float32)
        + params["b_enc"], 0.0)
    head_ref = jnp.dot(h_ref.astype(jnp.bfloat16), params["w_head"],
                       preferred_element_type=jnp.float32) + params["b_head"]
    pi_ref = head_ref[:, :NUM_ACTIONS]
    v_ref = head_ref[:, NUM_ACTIONS:NUM_ACTIONS + 1]

    assert out["latent"].shape == (B, HIDDEN)
    assert out["pi_logits"].shape == (B, NUM_ACTIONS)
    assert out["vpred"].shape == (B, 1)
    assert jnp.allclose(out["latent"], h_ref, atol=2e-3, rtol=2e-3)
    assert jnp.allclose(out["pi_logits"], pi_ref, atol=2e-3, rtol=2e-3)
    assert jnp.allclose(out["vpred"], v_ref, atol=2e-3, rtol=2e-3)

    print("KERNEL_OK")
</pallas_src>

<mosaic_0001>
module attributes {stable_mosaic.version = 11 : i64} {
  func.func @_base_model_kernel(%arg0: i32, %arg1: memref<128x1024xbf16, #tpu.memory_space<vmem>>, %arg2: memref<1024x128xbf16, #tpu.memory_space<vmem>>, %arg3: memref<1x128xf32, #tpu.memory_space<vmem>>, %arg4: memref<128x128xbf16, #tpu.memory_space<vmem>>, %arg5: memref<1x128xf32, #tpu.memory_space<vmem>>, %arg6: memref<128x128xf32, #tpu.memory_space<vmem>>, %arg7: memref<128x128xf32, #tpu.memory_space<vmem>>) attributes {dimension_semantics = [#tpu.dimension_semantics<parallel>], iteration_bounds = array<i64: 1>, scalar_prefetch = 0 : i64, scratch_operands = 0 : i64, tpu.core_type = #tpu.core_type<tc>, window_params = [{transform_indices = @transform_0, window_bounds = array<i64: 128, 1024>}, {pipeline_mode = #tpu.pipeline_mode<synchronous>, transform_indices = @transform_1, window_bounds = array<i64: 1024, 128>}, {pipeline_mode = #tpu.pipeline_mode<synchronous>, transform_indices = @transform_2, window_bounds = array<i64: 1, 128>}, {pipeline_mode = #tpu.pipeline_mode<synchronous>, transform_indices = @transform_3, window_bounds = array<i64: 128, 128>}, {pipeline_mode = #tpu.pipeline_mode<synchronous>, transform_indices = @transform_4, window_bounds = array<i64: 1, 128>}, {transform_indices = @transform_5, window_bounds = array<i64: 128, 128>}, {transform_indices = @transform_6, window_bounds = array<i64: 128, 128>}]} {
    %c0 = arith.constant 0 : index
    %c0_0 = arith.constant 0 : index
    %0 = vector.load %arg1[%c0, %c0_0] : memref<128x1024xbf16, #tpu.memory_space<vmem>>, vector<128x1024xbf16>
    %c0_1 = arith.constant 0 : index
    %c0_2 = arith.constant 0 : index
    %1 = vector.load %arg2[%c0_1, %c0_2] : memref<1024x128xbf16, #tpu.memory_space<vmem>>, vector<1024x128xbf16>
    %cst = arith.constant dense<0.000000e+00> : vector<128x128xf32>
    %2 = tpu.matmul %0, %1, %cst {dimension_numbers = #tpu.dot_dimension_numbers<[1], [0], [0], [1], [0, 0, 1, 1], [], []>} : vector<128x1024xbf16>, vector<1024x128xbf16>, vector<128x128xf32> -> vector<128x128xf32>
    %c0_3 = arith.constant 0 : index
    %c0_4 = arith.constant 0 : index
    %3 = vector.load %arg3[%c0_3, %c0_4] : memref<1x128xf32, #tpu.memory_space<vmem>>, vector<1x128xf32>
    %4 = vector.broadcast %3 : vector<1x128xf32> to vector<128x128xf32>
    %5 = arith.addf %2, %4 : vector<128x128xf32>
    %cst_5 = arith.constant 0.000000e+00 : f32
    %6 = vector.broadcast %cst_5 : f32 to vector<128x128xf32>
    %7 = arith.maximumf %5, %6 : vector<128x128xf32>
    %c0_6 = arith.constant 0 : index
    %c0_7 = arith.constant 0 : index
    %8 = vector.load %arg6[%c0_6, %c0_7] : memref<128x128xf32, #tpu.memory_space<vmem>>, vector<128x128xf32>
    tpu.vector_store %arg6[%c0_6, %c0_7], %7 {strides = array<i32>} : memref<128x128xf32, #tpu.memory_space<vmem>>, vector<128x128xf32>,
    %9 = arith.truncf %7 : vector<128x128xf32> to vector<128x128xbf16>
    %c0_8 = arith.constant 0 : index
    %c0_9 = arith.constant 0 : index
    %10 = vector.load %arg4[%c0_8, %c0_9] : memref<128x128xbf16, #tpu.memory_space<vmem>>, vector<128x128xbf16>
    %cst_10 = arith.constant dense<0.000000e+00> : vector<128x128xf32>
    %11 = tpu.matmul %9, %10, %cst_10 {dimension_numbers = #tpu.dot_dimension_numbers<[1], [0], [0], [1], [0, 0, 1, 1], [], []>} : vector<128x128xbf16>, vector<128x128xbf16>, vector<128x128xf32> -> vector<128x128xf32>
    %c0_11 = arith.constant 0 : index
    %c0_12 = arith.constant 0 : index
    %12 = vector.load %arg5[%c0_11, %c0_12] : memref<1x128xf32, #tpu.memory_space<vmem>>, vector<1x128xf32>
    %13 = vector.broadcast %12 : vector<1x128xf32> to vector<128x128xf32>
    %14 = arith.addf %11, %13 : vector<128x128xf32>
    %c0_13 = arith.constant 0 : index
    %c0_14 = arith.constant 0 : index
    %15 = vector.load %arg7[%c0_13, %c0_14] : memref<128x128xf32, #tpu.memory_space<vmem>>, vector<128x128xf32>
    tpu.vector_store %arg7[%c0_13, %c0_14], %14 {strides = array<i32>} : memref<128x128xf32, #tpu.memory_space<vmem>>, vector<128x128xf32>,
    return
  }
  func.func @transform_0(%arg0: i32) -> (i32, i32) {
    %c0_i32 = arith.constant 0 : i32
    %c0_i32_0 = arith.constant 0 : i32
    return %arg0, %c0_i32 : i32, i32
  }
  func.func @transform_1(%arg0: i32) -> (i32, i32) {
    %c0_i32 = arith.constant 0 : i32
    %c0_i32_0 = arith.constant 0 : i32
    %c0_i32_1 = arith.constant 0 : i32
    return %c0_i32, %c0_i32_0 : i32, i32
  }
  func.func @transform_2(%arg0: i32) -> (i32, i32) {
    %c0_i32 = arith.constant 0 : i32
    %c0_i32_0 = arith.constant 0 : i32
    %c0_i32_1 = arith.constant 0 : i32
    return %c0_i32, %c0_i32_0 : i32, i32
  }
  func.func @transform_3(%arg0: i32) -> (i32, i32) {
    %c0_i32 = arith.constant 0 : i32
    %c0_i32_0 = arith.constant 0 : i32
    %c0_i32_1 = arith.constant 0 : i32
    return %c0_i32, %c0_i32_0 : i32, i32
  }
  func.func @transform_4(%arg0: i32) -> (i32, i32) {
    %c0_i32 = arith.constant 0 : i32
    %c0_i32_0 = arith.constant 0 : i32
    %c0_i32_1 = arith.constant 0 : i32
    return %c0_i32, %c0_i32_0 : i32, i32
  }
  func.func @transform_5(%arg0: i32) -> (i32, i32) {
    %c0_i32 = arith.constant 0 : i32
    %c0_i32_0 = arith.constant 0 : i32
    return %arg0, %c0_i32 : i32, i32
  }
  func.func @transform_6(%arg0: i32) -> (i32, i32) {
    %c0_i32 = arith.constant 0 : i32
    %c0_i32_0 = arith.constant 0 : i32
    return %arg0, %c0_i32 : i32, i32
  }
}

</mosaic_0001>

<bundles_post_ra>
// kernel: tpu_custom_call.1
= control target key start
LH: loop header
LB: loop body
LE: loop exit
PB: predicated region body
PF: predicated region fallthrough
CT: control target
= control target key end

     0   :  { %12 = vsyncpa [#allocation3], 0  ;;  %s2464_s0 = inlined_call_operand.hbm [shape: bf16[128,1024], index: 0, kind: input, shape index: {}]   ;;  %s2465_s1 = inlined_call_operand.hbm [shape: bf16[1024,128], index: 1, kind: input, shape index: {}]   ;;  %s2466_s2 = inlined_call_operand.vmem [shape: f32[1,128], index: 2, kind: input, shape index: {}]   ;;  %s2467_s3 = inlined_call_operand.hbm [shape: bf16[128,128], index: 3, kind: input, shape index: {}]   ;;  %s2468_s4 = inlined_call_operand.vmem [shape: f32[1,128], index: 4, kind: input, shape index: {}]   ;;  %s2469_s5 = inlined_call_operand.hbm [shape: f32[128,128], index: 5, kind: output, shape index: {0}]   ;;  %s2470_s6 = inlined_call_operand.hbm [shape: f32[128,128], index: 6, kind: output, shape index: {1}]  }
   0x1   :  { %13 = vsyncpa [#allocation6], 0 }
   0x2   :  { %14 = vsyncpa [#allocation4], 0 }
   0x3   :  { %15 = vsyncpa [#allocation10], 0  ;;  %s2274_s21 = smov [#allocation5]   ;;  %s2156_s25 = scalar_lea.hbm %s2465_s1, 8192 }
   0x4   :  { %s33_s22 = sshll.u32 %s2274_s21, 4  ;;  %p2157_p0 = scmp.ne.s32.totalorder %s2465_s1, %s2156_s25  ;;  %s34_s22 = int_to_ptr.vmem [resolvable:$true] %s33_s22 }
   0x5   :  { %p2160_p1 = scmp.lt.u32.totalorder %s2156_s25, %s2465_s1 }
   0x7   :  { %p2162_p2 = pnand %p2160_p1, %p2157_p0 }
   0x9   :  { %2165 = shalt.err (!%p2162_p2)
}
   0xa   :  { %s2166_s30 = scalar_lea.vmem %s34_s22, 8192  ;;  %p2171_p4 = scmp.lt.s32.totalorder %s34_s22, %s34_s22 }
   0xb   :  { %p2167_p3 = scmp.ne.s32.totalorder %s34_s22, %s2166_s30  ;;  %p2172_p5 = scmp.lt.s32.totalorder %s2166_s30, %s2166_s30 }
   0xd   :  { %p2173_p6 = por %p2172_p5, %p2171_p4 }
   0xf   :  { %p2174_p7 = pnand %p2173_p6, %p2167_p3 }
  0x11   :  { %2177 = shalt.err (!%p2174_p7)
}
  0x12   :  { %s2275_s7 = smov 64   ;;  %s2276_s8 = smov 4  }
  0x13   :  { %39 = dma.hbm_to_vmem [thread:$0]  %s2465_s1, 8192, %s34_s22, [#allocation6], %s2275_s7, %s2275_s7, %s2276_s8  }
  0x14   :  { %s2277_s11 = smov [#allocation2]   ;;  %s2178_s15 = scalar_lea.hbm %s2464_s0, 8192 }
  0x15   :  { %s21_s12 = sshll.u32 %s2277_s11, 4  ;;  %p2179_p8 = scmp.ne.s32.totalorder %s2464_s0, %s2178_s15  ;;  %s22_s12 = int_to_ptr.vmem [resolvable:$true] %s21_s12 }
  0x16   :  { %p2182_p9 = scmp.lt.u32.totalorder %s2178_s15, %s2464_s0 }
  0x18   :  { %p2184_p10 = pnand %p2182_p9, %p2179_p8 }
  0x1a   :  { %2187 = shalt.err (!%p2184_p10)
}
  0x1b   :  { %s2188_s20 = scalar_lea.vmem %s22_s12, 8192  ;;  %p2193_p12 = scmp.lt.s32.totalorder %s22_s12, %s22_s12 }
  0x1c   :  { %p2189_p11 = scmp.ne.s32.totalorder %s22_s12, %s2188_s20  ;;  %p2194_p13 = scmp.lt.s32.totalorder %s2188_s20, %s2188_s20 }
  0x1e   :  { %p2195_p0 = por %p2194_p13, %p2193_p12 }
  0x20   :  { %p2196_p1 = pnand %p2195_p0, %p2189_p11 }
  0x22   :  { %2199 = shalt.err (!%p2196_p1)
}
  0x23   :  { %s2278_s1 = smov 512   ;;  %s2279_s21 = smov 32  }
  0x24   :  { %27 = dma.hbm_to_vmem [thread:$0]  %s2464_s0, 8192, %s22_s12, [#allocation3], %s2278_s1, %s2278_s1, %s2279_s21  }
  0x25   :  { %s2280_s24 = smov [#allocation7]   ;;  %s2200_s28 = scalar_lea.hbm %s2467_s3, 1024 }
  0x26   :  { %s47_s25 = sshll.u32 %s2280_s24, 4  ;;  %p2201_p2 = scmp.ne.s32.totalorder %s2467_s3, %s2200_s28  ;;  %s48_s25 = int_to_ptr.vmem [resolvable:$true] %s47_s25 }
  0x27   :  { %p2204_p3 = scmp.lt.u32.totalorder %s2200_s28, %s2467_s3 }
  0x29   :  { %p2206_p4 = pnand %p2204_p3, %p2201_p2 }
  0x2b   :  { %2209 = shalt.err (!%p2206_p4)
}
  0x2c   :  { %s2210_s11 = scalar_lea.vmem %s48_s25, 1024  ;;  %p2215_p6 = scmp.lt.s32.totalorder %s48_s25, %s48_s25 }
  0x2d   :  { %p2211_p5 = scmp.ne.s32.totalorder %s48_s25, %s2210_s11  ;;  %p2216_p7 = scmp.lt.s32.totalorder %s2210_s11, %s2210_s11 }
  0x2f   :  { %p2217_p8 = por %p2216_p7, %p2215_p6 }
  0x31   :  { %p2218_p9 = pnand %p2217_p8, %p2211_p5 }
  0x33   :  { %2221 = shalt.err (!%p2218_p9)
}
  0x34   :  { %53 = dma.hbm_to_vmem [thread:$0]  %s2467_s3, 1024, %s48_s25, [#allocation6], %s2275_s7, %s2275_s7, %s2276_s8  }
  0x35   :  { %2266 = dma.done.wait [#allocation3], 8192  }
  0x36   :  { %2267 = vsyncadd [#allocation3], 4294959104 }
  0x37   :  { %2268 = dma.done.wait [#allocation6], 9216  }
  0x38   :  { %2269 = vsyncadd [#allocation6], 4294958080  ;;  %v2084_v0 = vld [vmem:[#allocation5 + $0x40] sm:$0xff]   ;;  %v2088_v4 = vld [vmem:[#allocation5 + $0x48] sm:$0xff]  }
  0x39   :  { %v2085_v1 = vld [vmem:[#allocation5 + $0xc0] sm:$0xff]   ;;  %1753 = vmatprep.subr.bf16.mxu0 %v2084_v0  ;;  %v2089_v5 = vld [vmem:[#allocation5 + $0xc8] sm:$0xff]   ;;  %v2092_v8 = vld [vmem:[#allocation5 + $0x50] sm:$0xff]  }
  0x3a   :  { %v2086_v2 = vld [vmem:[#allocation5] sm:$0xff]   ;;  %1817 = vmatprep.subr.bf16.mxu1 %v2085_v1  ;;  %v2090_v6 = vld [vmem:[#allocation5 + $0x8] sm:$0xff]   ;;  %v2093_v9 = vld [vmem:[#allocation5 + $0xd0] sm:$0xff]  }
  0x3b   :  { %v2087_v3 = vld [vmem:[#allocation5 + $0x80] sm:$0xff]   ;;  %1754 = vmatpush3.bf16.msra.mxu0 %v2086_v2  ;;  %v2091_v7 = vld [vmem:[#allocation5 + $0x88] sm:$0xff]   ;;  %v2094_v10 = vld [vmem:[#allocation5 + $0x10] sm:$0xff]  }
  0x3c   :  { %1818 = vmatpush3.bf16.msra.mxu1 %v2087_v3  ;;  %1755 = vmatprep.subr.bf16.mxu0 %v2088_v4  ;;  %v2095_v11 = vld [vmem:[#allocation5 + $0x90] sm:$0xff]   ;;  %v2096_v12 = vld [vmem:[#allocation5 + $0x58] sm:$0xff]   ;;  %v2100_v16 = vld [vmem:[#allocation5 + $0x60] sm:$0xff]  }
  0x3d   :  { %1819 = vmatprep.subr.bf16.mxu1 %v2089_v5  ;;  %v2097_v13 = vld [vmem:[#allocation5 + $0xd8] sm:$0xff]   ;;  %v2101_v17 = vld [vmem:[#allocation5 + $0xe0] sm:$0xff]   ;;  %v2104_v20 = vld [vmem:[#allocation5 + $0x68] sm:$0xff]  }
  0x3e   :  { %v2098_v14 = vld [vmem:[#allocation5 + $0x18] sm:$0xff]   ;;  %v2102_v18 = vld [vmem:[#allocation5 + $0x20] sm:$0xff]   ;;  %v2105_v21 = vld [vmem:[#allocation5 + $0xe8] sm:$0xff]  }
  0x3f   :  { %1756 = vmatpush3.bf16.msra.mxu0 %v2090_v6  ;;  %v2099_v15 = vld [vmem:[#allocation5 + $0x98] sm:$0xff]   ;;  %v2103_v19 = vld [vmem:[#allocation5 + $0xa0] sm:$0xff]   ;;  %v2106_v22 = vld [vmem:[#allocation5 + $0x28] sm:$0xff]  }
  0x40   :  { %1820 = vmatpush3.bf16.msra.mxu1 %v2091_v7  ;;  %1757 = vmatprep.subr.bf16.mxu0 %v2092_v8  ;;  %v2107_v23 = vld [vmem:[#allocation5 + $0xa8] sm:$0xff]   ;;  %v2108_v24 = vld [vmem:[#allocation5 + $0x70] sm:$0xff]   ;;  %v2112_v28 = vld [vmem:[#allocation5 + $0x78] sm:$0xff]  }
  0x41   :  { %1821 = vmatprep.subr.bf16.mxu1 %v2093_v9  ;;  %v2109_v25 = vld [vmem:[#allocation5 + $0xf0] sm:$0xff]   ;;  %v2113_v29 = vld [vmem:[#allocation5 + $0xf8] sm:$0xff]   ;;  %v66_v32 = vld [vmem:[#allocation2] sm:$0xff] }
  0x42   :  { %v2110_v26 = vld [vmem:[#allocation5 + $0x30] sm:$0xff]   ;;  %v2114_v30 = vld [vmem:[#allocation5 + $0x38] sm:$0xff]   ;;  %v70_v33 = vld [vmem:[#allocation2 + $0x20] sm:$0xff] }
  0x43   :  { %1758 = vmatpush3.bf16.msra.mxu0 %v2094_v10  ;;  %v2111_v27 = vld [vmem:[#allocation5 + $0xb0] sm:$0xff]   ;;  %v2115_v31 = vld [vmem:[#allocation5 + $0xb8] sm:$0xff]   ;;  %v67_v34 = vld [vmem:[#allocation2 + $0x8] sm:$0xff]  ;;  %v1616_v35 = vcombine.low %v66_v32, %v70_v33  ;;  %v1617_v36 = vcombine.high %v66_v32, %v70_v33 }
  0x44   :  { %1822 = vmatpush3.bf16.msra.mxu1 %v2095_v11  ;;  %1759 = vmatprep.subr.bf16.mxu0 %v2096_v12  ;;  %v71_v37 = vld [vmem:[#allocation2 + $0x28] sm:$0xff]  ;;  %v2116_v40 = vld [vmem:[#allocation5 + $0x140] sm:$0xff]   ;;  %v2124_v62 = vld [vmem:[#allocation5 + $0x150] sm:$0xff]  }
  0x45   :  { %1823 = vmatprep.subr.bf16.mxu1 %v2097_v13  ;;  %v1618_v38 = vcombine.low %v67_v34, %v71_v37  ;;  %v1619_v39 = vcombine.high %v67_v34, %v71_v37  ;;  %1001 = vmatprep.mubr.bf16.mxu0 %v1617_v36  ;;  %v2117_v41 = vld [vmem:[#allocation5 + $0x100] sm:$0xff]   ;;  %v75_v47 = vld [vmem:[#allocation2 + $0x48] sm:$0xff]  ;;  %v2125_v63 = vld [vmem:[#allocation5 + $0x110] sm:$0xff]  }
  0x46   :  { %v2118_v42 = vld [vmem:[#allocation5 + $0x1c0] sm:$0xff]   ;;  %v79_v48 = vld [vmem:[#allocation2 + $0x68] sm:$0xff]  ;;  %v2126_v0 = vld [vmem:[#allocation5 + $0x1d0] sm:$0xff]  }
  0x47   :  { %1760 = vmatpush3.bf16.msra.mxu0 %v2098_v14  ;;  %1098 = vmatprep.mubr.bf16.mxu1 %v1619_v39  ;;  %v2119_v43 = vld [vmem:[#allocation5 + $0x180] sm:$0xff]   ;;  %v1627_v49 = vcombine.high %v75_v47, %v79_v48  ;;  %v2120_v50 = vld [vmem:[#allocation5 + $0x148] sm:$0xff]   ;;  %v1626_v53 = vcombine.low %v75_v47, %v79_v48  ;;  %v2127_v1 = vld [vmem:[#allocation5 + $0x190] sm:$0xff]  }
  0x48   :  { %1824 = vmatpush3.bf16.msra.mxu1 %v2099_v15  ;;  %1761 = vmatprep.subr.bf16.mxu0 %v2100_v16  ;;  %v74_v44 = vld [vmem:[#allocation2 + $0x40] sm:$0xff]  ;;  %v2121_v52 = vld [vmem:[#allocation5 + $0x108] sm:$0xff]   ;;  %v2128_v10 = vld [vmem:[#allocation5 + $0x158] sm:$0xff]  }
  0x49   :  { %1825 = vmatprep.subr.bf16.mxu1 %v2101_v17  ;;  %v78_v45 = vld [vmem:[#allocation2 + $0x60] sm:$0xff]  ;;  %v2122_v54 = vld [vmem:[#allocation5 + $0x1c8] sm:$0xff]   ;;  %v2129_v11 = vld [vmem:[#allocation5 + $0x118] sm:$0xff]  }
  0x4a   :  { %v1625_v46 = vcombine.high %v74_v44, %v78_v45  ;;  %v1624_v51 = vcombine.low %v74_v44, %v78_v45  ;;  %v2123_v55 = vld [vmem:[#allocation5 + $0x188] sm:$0xff]   ;;  %v82_v56 = vld [vmem:[#allocation2 + $0x80] sm:$0xff]  ;;  %v2130_v12 = vld [vmem:[#allocation5 + $0x1d8] sm:$0xff]  }
  0x4b   :  { %1762 = vmatpush3.bf16.msra.mxu0 %v2102_v18  ;;  %v86_v57 = vld [vmem:[#allocation2 + $0xa0] sm:$0xff]  ;;  %v83_v58 = vld [vmem:[#allocation2 + $0x88] sm:$0xff]  ;;  %v2131_v13 = vld [vmem:[#allocation5 + $0x198] sm:$0xff]  }
  0x4c   :  { %1826 = vmatpush3.bf16.msra.mxu1 %v2103_v19  ;;  %1763 = vmatprep.subr.bf16.mxu0 %v2104_v20  ;;  %v87_v59 = vld [vmem:[#allocation2 + $0xa8] sm:$0xff]  ;;  %v1633_v60 = vcombine.high %v82_v56, %v86_v57  ;;  %v1632_v2 = vcombine.low %v82_v56, %v86_v57  ;;  %v90_v3 = vld [vmem:[#allocation2 + $0xc0] sm:$0xff]  ;;  %v2141_v39 = vld [vmem:[#allocation5 + $0x130] sm:$0xff]  }
  0x4d   :  { %1827 = vmatprep.subr.bf16.mxu1 %v2105_v21  ;;  %v1635_v61 = vcombine.high %v83_v58, %v87_v59  ;;  %v94_v4 = vld [vmem:[#allocation2 + $0xe0] sm:$0xff]  ;;  %v91_v5 = vld [vmem:[#allocation2 + $0xc8] sm:$0xff]  ;;  %v1634_v6 = vcombine.low %v83_v58, %v87_v59  ;;  %v2145_v48 = vld [vmem:[#allocation5 + $0x138] sm:$0xff]  }
  0x4e   :  { %v1641_v7 = vcombine.high %v90_v3, %v94_v4  ;;  %v95_v8 = vld [vmem:[#allocation2 + $0xe8] sm:$0xff]  ;;  %v98_v14 = vld [vmem:[#allocation2 + $0x100] sm:$0xff]  ;;  %v1640_v19 = vcombine.low %v90_v3, %v94_v4 }
  0x4f   :  { %1764 = vmatpush3.bf16.msra.mxu0 %v2106_v22  ;;  %v1643_v9 = vcombine.high %v91_v5, %v95_v8  ;;  %v102_v15 = vld [vmem:[#allocation2 + $0x120] sm:$0xff]  ;;  %v99_v16 = vld [vmem:[#allocation2 + $0x108] sm:$0xff]  ;;  %v1642_v21 = vcombine.low %v91_v5, %v95_v8  ;;  %v77_v8 = vld [vmem:[#allocation2 + $0x58] sm:$0xff] }
  0x50   :  { %1828 = vmatpush3.bf16.msra.mxu1 %v2107_v23  ;;  %1765 = vmatprep.subr.bf16.mxu0 %v2108_v24  ;;  %v103_v17 = vld [vmem:[#allocation2 + $0x128] sm:$0xff]  ;;  %v2132_v18 = vld [vmem:[#allocation5 + $0x160] sm:$0xff]   ;;  %v1649_v22 = vcombine.high %v98_v14, %v102_v15  ;;  %v1648_v34 = vcombine.low %v98_v14, %v102_v15  ;;  %v84_v14 = vld [vmem:[#allocation2 + $0x90] sm:$0xff] }
  0x51   :  { %1829 = vmatprep.subr.bf16.mxu1 %v2109_v25  ;;  %v2133_v20 = vld [vmem:[#allocation5 + $0x120] sm:$0xff]   ;;  %v1651_v24 = vcombine.high %v99_v16, %v103_v17  ;;  %v2138_v32 = vld [vmem:[#allocation5 + $0x1e8] sm:$0xff]   ;;  %v88_v15 = vld [vmem:[#allocation2 + $0xb0] sm:$0xff] }
  0x52   :  { %v2134_v23 = vld [vmem:[#allocation5 + $0x1e0] sm:$0xff]   ;;  %v2139_v33 = vld [vmem:[#allocation5 + $0x1a8] sm:$0xff]  }
  0x53   :  { %1766 = vmatpush3.bf16.msra.mxu0 %v2110_v26  ;;  %v2135_v25 = vld [vmem:[#allocation5 + $0x1a0] sm:$0xff]   ;;  %v115_v44 = vld [vmem:[#allocation2 + $0x188] sm:$0xff] }
  0x54   :  { %1830 = vmatpush3.bf16.msra.mxu1 %v2111_v27  ;;  %1767 = vmatprep.subr.bf16.mxu0 %v2112_v28  ;;  %v106_v26 = vld [vmem:[#allocation2 + $0x140] sm:$0xff]  ;;  %v2136_v28 = vld [vmem:[#allocation5 + $0x168] sm:$0xff]  }
  0x55   :  { %1831 = vmatprep.subr.bf16.mxu1 %v2113_v29  ;;  %v110_v27 = vld [vmem:[#allocation2 + $0x160] sm:$0xff]  ;;  %v107_v29 = vld [vmem:[#allocation2 + $0x148] sm:$0xff] }
  0x56   :  { %v1657_v36 = vcombine.high %v106_v26, %v110_v27  ;;  %v119_v45 = vld [vmem:[#allocation2 + $0x1a8] sm:$0xff]  ;;  %v1656_v47 = vcombine.low %v106_v26, %v110_v27  ;;  %v1636_v26 = vcombine.low %v84_v14, %v88_v15 }
  0x57   :  { %1768 = vmatpush3.bf16.msra.mxu0 %v2114_v30  ;;  %v111_v30 = vld [vmem:[#allocation2 + $0x168] sm:$0xff]  ;;  %v1666_v59 = vcombine.low %v115_v44, %v119_v45 }
  0x58   :  { %1832 = vmatpush3.bf16.msra.mxu1 %v2115_v31  ;;  %1881 = vmatprep.subr.bf16.mxu0 %v2116_v40  ;;  %v2137_v31 = vld [vmem:[#allocation5 + $0x128] sm:$0xff]   ;;  %v1659_v37 = vcombine.high %v107_v29, %v111_v30  ;;  %v2142_v40 = vld [vmem:[#allocation5 + $0x1f0] sm:$0xff]  }
  0x59   :  { %1945 = vmatprep.subr.bf16.mxu1 %v2118_v42  ;;  %v118_v42 = vld [vmem:[#allocation2 + $0x1a0] sm:$0xff]  ;;  %v123_v56 = vld [vmem:[#allocation2 + $0x1c8] sm:$0xff] }
  0x5a   :  { %1002 = vmatmul.mubr.bf16.vlgmr.msra.gmra.mrb[0].mxu0 %v1616_v35  ;;  %v1650_v35 = vcombine.low %v99_v16, %v103_v17  ;;  %v127_v57 = vld [vmem:[#allocation2 + $0x1e8] sm:$0xff]  ;;  %v85_v16 = vld [vmem:[#allocation2 + $0x98] sm:$0xff] }
  0x5b   :  { %1099 = vmatmul.mubr.bf16.vlgmr.msra.gmra.mrb[0].mxu1 %v1618_v38  ;;  %1882 = vmatpush3.bf16.msra.mxu0 %v2117_v41  ;;  %v2140_v38 = vld [vmem:[#allocation5 + $0x170] sm:$0xff]   ;;  %v114_v41 = vld [vmem:[#allocation2 + $0x180] sm:$0xff]  ;;  %v1674_v3 = vcombine.low %v123_v56, %v127_v57  ;;  %v89_v17 = vld [vmem:[#allocation2 + $0xb8] sm:$0xff] }
  0x5c   :  { %1946 = vmatpush3.bf16.msra.mxu1 %v2119_v43  ;;  %1009 = vmatprep.mubr.bf16.mxu0 %v1625_v46  ;;  %v2143_v43 = vld [vmem:[#allocation5 + $0x1b0] sm:$0xff]   ;;  %v2144_v46 = vld [vmem:[#allocation5 + $0x178] sm:$0xff]   ;;  %v1664_v58 = vcombine.low %v114_v41, %v118_v42  ;;  %v1638_v27 = vcombine.low %v85_v16, %v89_v17 }
  0x5d   :  { %1106 = vmatprep.mubr.bf16.mxu1 %v1627_v49  ;;  %1883 = vmatprep.subr.bf16.mxu0 %v2120_v50  ;;  %v1658_v49 = vcombine.low %v107_v29, %v111_v30  ;;  %v1665_v50 = vcombine.high %v114_v41, %v118_v42  ;;  %v100_v30 = vld [vmem:[#allocation2 + $0x110] sm:$0xff]  ;;  %v113_v41 = vld [vmem:[#allocation2 + $0x178] sm:$0xff] }
  0x5e   :  { %1947 = vmatprep.subr.bf16.mxu1 %v2122_v54  ;;  %v122_v54 = vld [vmem:[#allocation2 + $0x1c0] sm:$0xff] }
  0x5f   :  { %1884 = vmatpush3.bf16.msra.mxu0 %v2121_v52  ;;  %v1667_v52 = vcombine.high %v115_v44, %v119_v45 }
  0x60   :  { %1948 = vmatpush3.bf16.msra.mxu1 %v2123_v55  ;;  %1885 = vmatprep.subr.bf16.mxu0 %v2124_v62  ;;  %v126_v55 = vld [vmem:[#allocation2 + $0x1e0] sm:$0xff]  ;;  %v68_v62 = vld [vmem:[#allocation2 + $0x10] sm:$0xff] }
  0x61   :  { %1949 = vmatprep.subr.bf16.mxu1 %v2126_v0  ;;  %v69_v0 = vld [vmem:[#allocation2 + $0x18] sm:$0xff] }
  0x62   :  { %1010 = vmatmul.mubr.bf16.gmra.mrb[4].mxu0 %v1624_v51  ;;  %v2146_v51 = vld [vmem:[#allocation5 + $0x1f8] sm:$0xff]  }
  0x63   :  { %1107 = vmatmul.mubr.bf16.gmra.mrb[4].mxu1 %v1626_v53  ;;  %1017 = vmatprep.mubr.bf16.mxu0 %v1633_v60  ;;  %v2147_v53 = vld [vmem:[#allocation5 + $0x1b8] sm:$0xff]   ;;  %v1673_v60 = vcombine.high %v122_v54, %v126_v55 }
  0x64   :  { %1114 = vmatprep.mubr.bf16.mxu1 %v1635_v61  ;;  %1886 = vmatpush3.bf16.msra.mxu0 %v2125_v63  ;;  %v1675_v61 = vcombine.high %v123_v56, %v127_v57  ;;  %v72_v63 = vld [vmem:[#allocation2 + $0x30] sm:$0xff]  ;;  %v125_v56 = vld [vmem:[#allocation2 + $0x1d8] sm:$0xff] }
  0x65   :  { %1950 = vmatpush3.bf16.msra.mxu1 %v2127_v1  ;;  %1887 = vmatprep.subr.bf16.mxu0 %v2128_v10  ;;  %v73_v1 = vld [vmem:[#allocation2 + $0x38] sm:$0xff]  ;;  %v1621_v4 = vcombine.high %v68_v62, %v72_v63  ;;  %v1620_v10 = vcombine.low %v68_v62, %v72_v63 }
  0x66   :  { %1951 = vmatprep.subr.bf16.mxu1 %v2130_v12  ;;  %v1623_v5 = vcombine.high %v69_v0, %v73_v1  ;;  %v129_v57 = vld [vmem:[#allocation2 + $0x1f8] sm:$0xff] }
  0x67   :  { %v1678_v63 = vcombine.low %v125_v56, %v129_v57 }
  0x68   :  { %1888 = vmatpush3.bf16.msra.mxu0 %v2129_v11  ;;  %v1622_v11 = vcombine.low %v69_v0, %v73_v1  ;;  %v2148_v0 = vld [vmem:[#allocation7] sm:$0xff]   ;;  %v2149_v1 = vld [vmem:[#allocation7 + $0x8] sm:$0xff]  }
  0x69   :  { %1952 = vmatpush3.bf16.msra.mxu1 %v2131_v13  ;;  %1889 = vmatprep.subr.bf16.mxu0 %v2132_v18 }
  0x6a   :  { %1018 = vmatmul.mubr.bf16.gmra.mrb[8].mxu0 %v1632_v2  ;;  %1953 = vmatprep.subr.bf16.mxu1 %v2134_v23  ;;  %v1672_v2 = vcombine.low %v122_v54, %v126_v55  ;;  %v96_v23 = vld [vmem:[#allocation2 + $0xf0] sm:$0xff] }
  0x6b   :  { %1115 = vmatmul.mubr.bf16.gmra.mrb[8].mxu1 %v1634_v6  ;;  %1025 = vmatprep.mubr.bf16.mxu0 %v1641_v7  ;;  %v76_v6 = vld [vmem:[#allocation2 + $0x50] sm:$0xff] }
  0x6c   :  { %1122 = vmatprep.mubr.bf16.mxu1 %v1643_v9  ;;  %1890 = vmatpush3.bf16.msra.mxu0 %v2133_v20  ;;  %v80_v7 = vld [vmem:[#allocation2 + $0x70] sm:$0xff]  ;;  %v81_v9 = vld [vmem:[#allocation2 + $0x78] sm:$0xff]  ;;  %v1637_v20 = vcombine.high %v84_v14, %v88_v15 }
  0x6d   :  { %1954 = vmatpush3.bf16.msra.mxu1 %v2135_v25  ;;  %1891 = vmatprep.subr.bf16.mxu0 %v2136_v28  ;;  %v1629_v12 = vcombine.high %v76_v6, %v80_v7  ;;  %v1631_v13 = vcombine.high %v77_v8, %v81_v9  ;;  %v1628_v18 = vcombine.low %v76_v6, %v80_v7  ;;  %v97_v25 = vld [vmem:[#allocation2 + $0xf8] sm:$0xff]  ;;  %v124_v54 = vld [vmem:[#allocation2 + $0x1d0] sm:$0xff] }
  0x6e   :  { %1955 = vmatprep.subr.bf16.mxu1 %v2138_v32  ;;  %v101_v32 = vld [vmem:[#allocation2 + $0x118] sm:$0xff]  ;;  %v128_v55 = vld [vmem:[#allocation2 + $0x1f0] sm:$0xff] }
  0x6f   :  { %v1676_v62 = vcombine.low %v124_v54, %v128_v55  ;;  %v2154_v6 = vld [vmem:[#allocation7 + $0x30] sm:$0xff]   ;;  %v2155_v7 = vld [vmem:[#allocation7 + $0x38] sm:$0xff]  }
  0x70   :  { %1892 = vmatpush3.bf16.msra.mxu0 %v2137_v31  ;;  %v104_v31 = vld [vmem:[#allocation2 + $0x130] sm:$0xff] }
  0x71   :  { %1956 = vmatpush3.bf16.msra.mxu1 %v2139_v33  ;;  %1893 = vmatprep.subr.bf16.mxu0 %v2140_v38  ;;  %v105_v33 = vld [vmem:[#allocation2 + $0x138] sm:$0xff]  ;;  %v108_v38 = vld [vmem:[#allocation2 + $0x150] sm:$0xff]  ;;  %v1652_v42 = vcombine.low %v100_v30, %v104_v31 }
  0x72   :  { %1026 = vmatmul.mubr.bf16.gmra.mrb[12].mxu0 %v1640_v19  ;;  %1957 = vmatprep.subr.bf16.mxu1 %v2142_v40  ;;  %v1630_v19 = vcombine.low %v77_v8, %v81_v9  ;;  %v109_v40 = vld [vmem:[#allocation2 + $0x158] sm:$0xff] }
  0x73   :  { %1123 = vmatmul.mubr.bf16.gmra.mrb[12].mxu1 %v1642_v21  ;;  %1033 = vmatprep.mubr.bf16.mxu0 %v1649_v22  ;;  %v1639_v21 = vcombine.high %v85_v16, %v89_v17  ;;  %v92_v22 = vld [vmem:[#allocation2 + $0xd0] sm:$0xff]  ;;  %v1663_v45 = vcombine.high %v109_v40, %v113_v41 }
  0x74   :  { %1130 = vmatprep.mubr.bf16.mxu1 %v1651_v24  ;;  %1894 = vmatpush3.bf16.msra.mxu0 %v2141_v39  ;;  %v93_v24 = vld [vmem:[#allocation2 + $0xd8] sm:$0xff]  ;;  %v1645_v28 = vcombine.high %v92_v22, %v96_v23  ;;  %v112_v39 = vld [vmem:[#allocation2 + $0x170] sm:$0xff] }
  0x75   :  { %1958 = vmatpush3.bf16.msra.mxu1 %v2143_v43  ;;  %1895 = vmatprep.subr.bf16.mxu0 %v2144_v46  ;;  %v1647_v29 = vcombine.high %v93_v24, %v97_v25  ;;  %v1654_v43 = vcombine.low %v101_v32, %v105_v33  ;;  %v1661_v44 = vcombine.high %v108_v38, %v112_v39  ;;  %v116_v46 = vld [vmem:[#allocation2 + $0x190] sm:$0xff] }
  0x76   :  { %1959 = vmatprep.subr.bf16.mxu1 %v2146_v51  ;;  %v1662_v51 = vcombine.low %v109_v40, %v113_v41 }
  0x78   :  { %1896 = vmatpush3.bf16.msra.mxu0 %v2145_v48  ;;  %v117_v48 = vld [vmem:[#allocation2 + $0x198] sm:$0xff] }
  0x79   :  { %1960 = vmatpush3.bf16.msra.mxu1 %v2147_v53  ;;  %2025 = vmatprep.subr.bf16.mxu0 %v2148_v0 }
  0x7a   :  { %1034 = vmatmul.mubr.bf16.gmra.mrb[16].mxu0 %v1648_v34  ;;  %v1644_v34 = vcombine.low %v92_v22, %v96_v23  ;;  %2057 = vmatprep.subr.bf16.mxu1 %v2148_v0 }
  0x7b   :  { %1131 = vmatmul.mubr.bf16.gmra.mrb[16].mxu1 %v1650_v35  ;;  %1041 = vmatprep.mubr.bf16.mxu0 %v1657_v36  ;;  %v1646_v35 = vcombine.low %v93_v24, %v97_v25  ;;  %v1653_v36 = vcombine.high %v100_v30, %v104_v31 }
  0x7c   :  { %1138 = vmatprep.mubr.bf16.mxu1 %v1659_v37  ;;  %v1655_v37 = vcombine.high %v101_v32, %v105_v33 }
  0x82   :  { %1042 = vmatmul.mubr.bf16.gmra.mrb[20].mxu0 %v1656_v47  ;;  %v120_v47 = vld [vmem:[#allocation2 + $0x1b0] sm:$0xff] }
  0x83   :  { %1139 = vmatmul.mubr.bf16.gmra.mrb[20].mxu1 %v1658_v49  ;;  %1049 = vmatprep.mubr.bf16.mxu0 %v1665_v50  ;;  %v121_v49 = vld [vmem:[#allocation2 + $0x1b8] sm:$0xff]  ;;  %v1660_v50 = vcombine.low %v108_v38, %v112_v39 }
  0x84   :  { %1146 = vmatprep.mubr.bf16.mxu1 %v1667_v52  ;;  %v1669_v52 = vcombine.high %v116_v46, %v120_v47  ;;  %v1671_v53 = vcombine.high %v117_v48, %v121_v49 }
  0x8a   :  { %1050 = vmatmul.mubr.bf16.gmra.mrb[24].mxu0 %v1664_v58  ;;  %v1668_v58 = vcombine.low %v116_v46, %v120_v47 }
  0x8b   :  { %1147 = vmatmul.mubr.bf16.gmra.mrb[24].mxu1 %v1666_v59  ;;  %1057 = vmatprep.mubr.bf16.mxu0 %v1673_v60  ;;  %v1670_v59 = vcombine.low %v117_v48, %v121_v49  ;;  %v1677_v60 = vcombine.high %v124_v54, %v128_v55 }
  0x8c   :  { %1154 = vmatprep.mubr.bf16.mxu1 %v1675_v61  ;;  %v1679_v61 = vcombine.high %v125_v56, %v129_v57 }
  0x92   :  { %1058 = vmatmul.mubr.bf16.gmra.mrb[28].mxu0 %v1672_v2  ;;  %v2150_v2 = vld [vmem:[#allocation7 + $0x10] sm:$0xff]  }
  0x93   :  { %1155 = vmatmul.mubr.bf16.gmra.mrb[28].mxu1 %v1674_v3  ;;  %1195 = vmatprep.mubr.bf16.mxu0 %v1621_v4  ;;  %v2151_v3 = vld [vmem:[#allocation7 + $0x18] sm:$0xff]   ;;  %v2152_v4 = vld [vmem:[#allocation7 + $0x20] sm:$0xff]  }
  0x94   :  { %1292 = vmatprep.mubr.bf16.mxu1 %v1623_v5  ;;  %v2153_v5 = vld [vmem:[#allocation7 + $0x28] sm:$0xff]  }
  0x9a   :  { %1196 = vmatmul.mubr.bf16.vlgmr.msra.gmra.mrb[32].mxu0 %v1620_v10  ;;  %v2365_v10 = vld [vmem:[%s2466_s2] ss:$0 sm:$0xff]  ;;  %s2281_s2 = smov [#allocation8]  }
  0x9b   :  { %1293 = vmatmul.mubr.bf16.vlgmr.msra.gmra.mrb[32].mxu1 %v1622_v11  ;;  %1203 = vmatprep.mubr.bf16.mxu0 %v1629_v12  ;;  %s1586_s8 = sshll.u32 %s2281_s2, 4  ;;  %s1587_s8 = int_to_ptr.vmem [resolvable:$true] %s1586_s8 }
  0x9c   :  { %1300 = vmatprep.mubr.bf16.mxu1 %v1631_v13  ;;  %2026 = vmatpush3.bf16.msra.mxu0 %v2148_v0  ;;  %s2222_s13 = scalar_lea.vmem %s1587_s8, 2048  ;;  %p2227_p11 = scmp.lt.s32.totalorder %s1587_s8, %s1587_s8 }
  0x9d   :  { %2065 = vmatpush3.bf16.msra.mxu1 %v2148_v0  ;;  %2027 = vmatprep.subr.bf16.mxu0 %v2149_v1  ;;  %p2223_p10 = scmp.ne.s32.totalorder %s1587_s8, %s2222_s13  ;;  %p2228_p12 = scmp.lt.s32.totalorder %s2222_s13, %s2222_s13 }
  0x9e   :  { %2058 = vmatprep.subr.bf16.mxu1 %v2149_v1 }
  0x9f   :  { %p2229_p13 = por %p2228_p12, %p2227_p11 }
  0xa0   :  { %2028 = vmatpush3.bf16.msra.mxu0 %v2149_v1 }
  0xa1   :  { %2066 = vmatpush3.bf16.msra.mxu1 %v2149_v1  ;;  %2029 = vmatprep.subr.bf16.mxu0 %v2150_v2  ;;  %p2230_p0 = pnand %p2229_p13, %p2223_p10 }
  0xa2   :  { %1204 = vmatmul.mubr.bf16.gmra.mrb[36].mxu0 %v1628_v18  ;;  %2059 = vmatprep.subr.bf16.mxu1 %v2150_v2 }
  0xa3   :  { %1301 = vmatmul.mubr.bf16.gmra.mrb[36].mxu1 %v1630_v19  ;;  %1211 = vmatprep.mubr.bf16.mxu0 %v1637_v20 }
  0xa4   :  { %1308 = vmatprep.mubr.bf16.mxu1 %v1639_v21  ;;  %2030 = vmatpush3.bf16.msra.mxu0 %v2150_v2 }
  0xa5   :  { %2067 = vmatpush3.bf16.msra.mxu1 %v2150_v2  ;;  %2031 = vmatprep.subr.bf16.mxu0 %v2151_v3 }
  0xa6   :  { %2060 = vmatprep.subr.bf16.mxu1 %v2151_v3 }
  0xa8   :  { %2032 = vmatpush3.bf16.msra.mxu0 %v2151_v3 }
  0xa9   :  { %2068 = vmatpush3.bf16.msra.mxu1 %v2151_v3  ;;  %2033 = vmatprep.subr.bf16.mxu0 %v2152_v4 }
  0xaa   :  { %1212 = vmatmul.mubr.bf16.gmra.mrb[40].mxu0 %v1636_v26  ;;  %2061 = vmatprep.subr.bf16.mxu1 %v2152_v4 }
  0xab   :  { %1309 = vmatmul.mubr.bf16.gmra.mrb[40].mxu1 %v1638_v27  ;;  %1219 = vmatprep.mubr.bf16.mxu0 %v1645_v28 }
  0xac   :  { %1316 = vmatprep.mubr.bf16.mxu1 %v1647_v29  ;;  %2034 = vmatpush3.bf16.msra.mxu0 %v2152_v4 }
  0xad   :  { %2069 = vmatpush3.bf16.msra.mxu1 %v2152_v4  ;;  %2035 = vmatprep.subr.bf16.mxu0 %v2153_v5 }
  0xae   :  { %2062 = vmatprep.subr.bf16.mxu1 %v2153_v5 }
  0xb0   :  { %2036 = vmatpush3.bf16.msra.mxu0 %v2153_v5 }
  0xb1   :  { %2070 = vmatpush3.bf16.msra.mxu1 %v2153_v5  ;;  %2037 = vmatprep.subr.bf16.mxu0 %v2154_v6 }
  0xb2   :  { %1220 = vmatmul.mubr.bf16.gmra.mrb[44].mxu0 %v1644_v34  ;;  %2063 = vmatprep.subr.bf16.mxu1 %v2154_v6 }
  0xb3   :  { %1317 = vmatmul.mubr.bf16.gmra.mrb[44].mxu1 %v1646_v35  ;;  %1227 = vmatprep.mubr.bf16.mxu0 %v1653_v36 }
  0xb4   :  { %1324 = vmatprep.mubr.bf16.mxu1 %v1655_v37  ;;  %2038 = vmatpush3.bf16.msra.mxu0 %v2154_v6 }
  0xb5   :  { %2071 = vmatpush3.bf16.msra.mxu1 %v2154_v6  ;;  %2039 = vmatprep.subr.bf16.mxu0 %v2155_v7 }
  0xb6   :  { %2064 = vmatprep.subr.bf16.mxu1 %v2155_v7 }
  0xb8   :  { %2040 = vmatpush3.bf16.msra.mxu0 %v2155_v7 }
  0xb9   :  { %2072 = vmatpush3.bf16.msra.mxu1 %v2155_v7 }
  0xba   :  { %1228 = vmatmul.mubr.bf16.gmra.mrb[48].mxu0 %v1652_v42 }
  0xbb   :  { %1325 = vmatmul.mubr.bf16.gmra.mrb[48].mxu1 %v1654_v43  ;;  %1235 = vmatprep.mubr.bf16.mxu0 %v1661_v44 }
  0xbc   :  { %1332 = vmatprep.mubr.bf16.mxu1 %v1663_v45 }
  0xc2   :  { %1236 = vmatmul.mubr.bf16.gmra.mrb[52].mxu0 %v1660_v50 }
  0xc3   :  { %1333 = vmatmul.mubr.bf16.gmra.mrb[52].mxu1 %v1662_v51  ;;  %1243 = vmatprep.mubr.bf16.mxu0 %v1669_v52 }
  0xc4   :  { %1340 = vmatprep.mubr.bf16.mxu1 %v1671_v53 }
  0xca   :  { %1244 = vmatmul.mubr.bf16.gmra.mrb[56].mxu0 %v1668_v58 }
  0xcb   :  { %1341 = vmatmul.mubr.bf16.gmra.mrb[56].mxu1 %v1670_v59  ;;  %1251 = vmatprep.mubr.bf16.mxu0 %v1677_v60 }
  0xcc   :  { %1348 = vmatprep.mubr.bf16.mxu1 %v1679_v61 }
  0xd2   :  { %1252 = vmatmul.mubr.bf16.gmra.mrb[60].mxu0 %v1676_v62 }
  0xd3   :  { %1349 = vmatmul.mubr.bf16.gmra.mrb[60].mxu1 %v1678_v63 }
 0x12d   :  { %v1769_v8 = vpop.f32.mrb[0].mxu0 }
 0x12e   :  { %v1833_v9 = vpop.f32.mrb[0].mxu1  ;;  %v1770_v11 = vpop.f32.mrb[1].mxu0 }
 0x12f   :  { %v1771_v12 = vadd.f32 %v1770_v11, %v1769_v8  ;;  %v1834_v13 = vpop.f32.mrb[1].mxu1  ;;  %v1772_v14 = vpop.f32.mrb[2].mxu0 }
 0x130   :  { %v1835_v15 = vadd.f32 %v1834_v13, %v1833_v9  ;;  %v1836_v16 = vpop.f32.mrb[2].mxu1  ;;  %v1773_v17 = vpop.f32.mrb[3].mxu0 }
 0x131   :  { %v1004_v18 = vadd.f32 %v1771_v12, %v2365_v10  ;;  %v1774_v19 = vadd.f32 %v1773_v17, %v1772_v14  ;;  %v1837_v20 = vpop.f32.mrb[3].mxu1 }
 0x132   :  { %v1838_v21 = vadd.f32 %v1837_v20, %v1836_v16 }
 0x133   :  { %v2368_v22 = vadd.f32 %v1835_v15, %v1004_v18  ;;  %v1007_v23 = vadd.f32 %v1774_v19, %v2365_v10 }
 0x135   :  { %v2371_v24 = vadd.f32 %v1838_v21, %v1007_v23  ;;  %v1775_v25 = vpop.f32.mrb[4].mxu0 }
 0x136   :  { %v1839_v26 = vpop.f32.mrb[4].mxu1  ;;  %v1776_v27 = vpop.f32.mrb[5].mxu0 }
 0x137   :  { %v1777_v28 = vadd.f32 %v1776_v27, %v1775_v25  ;;  %v1840_v29 = vpop.f32.mrb[5].mxu1  ;;  %v1778_v30 = vpop.f32.mrb[6].mxu0 }
 0x138   :  { %v1841_v31 = vadd.f32 %v1840_v29, %v1839_v26  ;;  %v1842_v32 = vpop.f32.mrb[6].mxu1  ;;  %v1779_v33 = vpop.f32.mrb[7].mxu0 }
 0x139   :  { %v1012_v34 = vadd.f32 %v1777_v28, %v2365_v10  ;;  %v1780_v35 = vadd.f32 %v1779_v33, %v1778_v30  ;;  %v1843_v36 = vpop.f32.mrb[7].mxu1 }
 0x13a   :  { %v1844_v37 = vadd.f32 %v1843_v36, %v1842_v32 }
 0x13b   :  { %v2374_v38 = vadd.f32 %v1841_v31, %v1012_v34  ;;  %v1015_v39 = vadd.f32 %v1780_v35, %v2365_v10 }
 0x13d   :  { %v2377_v40 = vadd.f32 %v1844_v37, %v1015_v39  ;;  %v1781_v41 = vpop.f32.mrb[8].mxu0 }
 0x13e   :  { %v1845_v42 = vpop.f32.mrb[8].mxu1  ;;  %v1782_v43 = vpop.f32.mrb[9].mxu0 }
 0x13f   :  { %v1783_v44 = vadd.f32 %v1782_v43, %v1781_v41  ;;  %v1846_v45 = vpop.f32.mrb[9].mxu1  ;;  %v1784_v46 = vpop.f32.mrb[10].mxu0 }
 0x140   :  { %v1847_v47 = vadd.f32 %v1846_v45, %v1845_v42  ;;  %v1848_v48 = vpop.f32.mrb[10].mxu1  ;;  %v1785_v49 = vpop.f32.mrb[11].mxu0 }
 0x141   :  { %v1020_v50 = vadd.f32 %v1783_v44, %v2365_v10  ;;  %v1786_v51 = vadd.f32 %v1785_v49, %v1784_v46  ;;  %v1849_v52 = vpop.f32.mrb[11].mxu1 }
 0x142   :  { %v1850_v53 = vadd.f32 %v1849_v52, %v1848_v48 }
 0x143   :  { %v2380_v54 = vadd.f32 %v1847_v47, %v1020_v50  ;;  %v1023_v55 = vadd.f32 %v1786_v51, %v2365_v10 }
 0x145   :  { %v2383_v56 = vadd.f32 %v1850_v53, %v1023_v55  ;;  %v1787_v57 = vpop.f32.mrb[12].mxu0 }
 0x146   :  { %v1851_v58 = vpop.f32.mrb[12].mxu1  ;;  %v1788_v59 = vpop.f32.mrb[13].mxu0 }
 0x147   :  { %v1789_v60 = vadd.f32 %v1788_v59, %v1787_v57  ;;  %v1852_v61 = vpop.f32.mrb[13].mxu1  ;;  %v1790_v62 = vpop.f32.mrb[14].mxu0 }
 0x148   :  { %v1853_v63 = vadd.f32 %v1852_v61, %v1851_v58  ;;  %v1854_v0 = vpop.f32.mrb[14].mxu1  ;;  %v1791_v1 = vpop.f32.mrb[15].mxu0 }
 0x149   :  { %v1028_v2 = vadd.f32 %v1789_v60, %v2365_v10  ;;  %v1792_v3 = vadd.f32 %v1791_v1, %v1790_v62  ;;  %v1855_v4 = vpop.f32.mrb[15].mxu1 }
 0x14a   :  { %v1856_v5 = vadd.f32 %v1855_v4, %v1854_v0 }
 0x14b   :  { %v2386_v6 = vadd.f32 %v1853_v63, %v1028_v2  ;;  %v1031_v7 = vadd.f32 %v1792_v3, %v2365_v10 }
 0x14d   :  { %v2389_v8 = vadd.f32 %v1856_v5, %v1031_v7  ;;  %v1793_v9 = vpop.f32.mrb[16].mxu0 }
 0x14e   :  { %v1857_v11 = vpop.f32.mrb[16].mxu1  ;;  %v1794_v12 = vpop.f32.mrb[17].mxu0 }
 0x14f   :  { %v1795_v13 = vadd.f32 %v1794_v12, %v1793_v9  ;;  %v1858_v14 = vpop.f32.mrb[17].mxu1  ;;  %v1796_v15 = vpop.f32.mrb[18].mxu0 }
 0x150   :  { %v1859_v16 = vadd.f32 %v1858_v14, %v1857_v11  ;;  %v1860_v17 = vpop.f32.mrb[18].mxu1  ;;  %v1797_v18 = vpop.f32.mrb[19].mxu0 }
 0x151   :  { %v1036_v19 = vadd.f32 %v1795_v13, %v2365_v10  ;;  %v1798_v20 = vadd.f32 %v1797_v18, %v1796_v15  ;;  %v1861_v21 = vpop.f32.mrb[19].mxu1 }
 0x152   :  { %v1862_v23 = vadd.f32 %v1861_v21, %v1860_v17 }
 0x153   :  { %v2392_v25 = vadd.f32 %v1859_v16, %v1036_v19  ;;  %v1039_v26 = vadd.f32 %v1798_v20, %v2365_v10 }
 0x155   :  { %v2395_v27 = vadd.f32 %v1862_v23, %v1039_v26  ;;  %v1799_v28 = vpop.f32.mrb[20].mxu0 }
 0x156   :  { %v1863_v29 = vpop.f32.mrb[20].mxu1  ;;  %v1800_v30 = vpop.f32.mrb[21].mxu0 }
 0x157   :  { %v1801_v31 = vadd.f32 %v1800_v30, %v1799_v28  ;;  %v1864_v32 = vpop.f32.mrb[21].mxu1  ;;  %v1802_v33 = vpop.f32.mrb[22].mxu0 }
 0x158   :  { %v1865_v34 = vadd.f32 %v1864_v32, %v1863_v29  ;;  %v1866_v35 = vpop.f32.mrb[22].mxu1  ;;  %v1803_v36 = vpop.f32.mrb[23].mxu0 }
 0x159   :  { %v1044_v37 = vadd.f32 %v1801_v31, %v2365_v10  ;;  %v1804_v39 = vadd.f32 %v1803_v36, %v1802_v33  ;;  %v1867_v41 = vpop.f32.mrb[23].mxu1 }
 0x15a   :  { %v1868_v42 = vadd.f32 %v1867_v41, %v1866_v35 }
 0x15b   :  { %v2398_v43 = vadd.f32 %v1865_v34, %v1044_v37  ;;  %v1047_v44 = vadd.f32 %v1804_v39, %v2365_v10 }
 0x15d   :  { %v2401_v45 = vadd.f32 %v1868_v42, %v1047_v44  ;;  %v1805_v46 = vpop.f32.mrb[24].mxu0 }
 0x15e   :  { %v1869_v47 = vpop.f32.mrb[24].mxu1  ;;  %v1806_v48 = vpop.f32.mrb[25].mxu0 }
 0x15f   :  { %v1807_v49 = vadd.f32 %v1806_v48, %v1805_v46  ;;  %v1870_v50 = vpop.f32.mrb[25].mxu1  ;;  %v1808_v51 = vpop.f32.mrb[26].mxu0 }
 0x160   :  { %v1871_v52 = vadd.f32 %v1870_v50, %v1869_v47  ;;  %v1872_v53 = vpop.f32.mrb[26].mxu1  ;;  %v1809_v55 = vpop.f32.mrb[27].mxu0 }
 0x161   :  { %v1052_v57 = vadd.f32 %v1807_v49, %v2365_v10  ;;  %v1810_v58 = vadd.f32 %v1809_v55, %v1808_v51  ;;  %v1873_v59 = vpop.f32.mrb[27].mxu1 }
 0x162   :  { %v1874_v60 = vadd.f32 %v1873_v59, %v1872_v53 }
 0x163   :  { %v2404_v61 = vadd.f32 %v1871_v52, %v1052_v57  ;;  %v1055_v62 = vadd.f32 %v1810_v58, %v2365_v10 }
 0x165   :  { %v2407_v63 = vadd.f32 %v1874_v60, %v1055_v62  ;;  %v1811_v0 = vpop.f32.mrb[28].mxu0 }
 0x166   :  { %v1875_v1 = vpop.f32.mrb[28].mxu1  ;;  %v1812_v2 = vpop.f32.mrb[29].mxu0 }
 0x167   :  { %v1813_v3 = vadd.f32 %v1812_v2, %v1811_v0  ;;  %v1876_v4 = vpop.f32.mrb[29].mxu1  ;;  %v1814_v5 = vpop.f32.mrb[30].mxu0 }
 0x168   :  { %v1877_v7 = vadd.f32 %v1876_v4, %v1875_v1  ;;  %v1878_v9 = vpop.f32.mrb[30].mxu1  ;;  %v1815_v11 = vpop.f32.mrb[31].mxu0 }
 0x169   :  { %v1060_v12 = vadd.f32 %v1813_v3, %v2365_v10  ;;  %v1816_v13 = vadd.f32 %v1815_v11, %v1814_v5  ;;  %v1879_v14 = vpop.f32.mrb[31].mxu1 }
 0x16a   :  { %v1880_v15 = vadd.f32 %v1879_v14, %v1878_v9 }
 0x16b   :  { %v2410_v16 = vadd.f32 %v1877_v7, %v1060_v12  ;;  %v1063_v17 = vadd.f32 %v1816_v13, %v2365_v10 }
 0x16d   :  { %v2413_v18 = vadd.f32 %v1880_v15, %v1063_v17  ;;  %v1897_v19 = vpop.f32.mrb[32].mxu0 }
 0x16e   :  { %v1961_v20 = vpop.f32.mrb[32].mxu1  ;;  %v1898_v21 = vpop.f32.mrb[33].mxu0 }
 0x16f   :  { %v1899_v23 = vadd.f32 %v1898_v21, %v1897_v19  ;;  %v1962_v26 = vpop.f32.mrb[33].mxu1  ;;  %v1900_v28 = vpop.f32.mrb[34].mxu0 }
 0x170   :  { %v1963_v29 = vadd.f32 %v1962_v26, %v1961_v20  ;;  %v1964_v30 = vpop.f32.mrb[34].mxu1  ;;  %v1901_v31 = vpop.f32.mrb[35].mxu0 }
 0x171   :  { %v1198_v32 = vadd.f32 %v1899_v23, %v2368_v22  ;;  %v1902_v33 = vadd.f32 %v1901_v31, %v1900_v28  ;;  %v1965_v34 = vpop.f32.mrb[35].mxu1 }
 0x172   :  { %v1966_v35 = vadd.f32 %v1965_v34, %v1964_v30 }
 0x173   :  { %v1295_v36 = vadd.f32 %v1963_v29, %v1198_v32  ;;  %v1201_v37 = vadd.f32 %v1902_v33, %v2371_v24 }
 0x175   :  { %v1357_v10 = vmax.f32 %v1295_v36, 0.0  ;;  %v1298_v39 = vadd.f32 %v1966_v35, %v1201_v37  ;;  %v1903_v41 = vpop.f32.mrb[36].mxu0 }
 0x176   :  { %v1967_v42 = vpop.f32.mrb[36].mxu1  ;;  %v1904_v44 = vpop.f32.mrb[37].mxu0 }
 0x177   :  { %1373 = vst [vmem:[#allocation8] sm:$0xff] %v1357_v10  ;;  %v1358_v46 = vmax.f32 %v1298_v39, 0.0  ;;  %v1905_v47 = vadd.f32 %v1904_v44, %v1903_v41  ;;  %v1968_v48 = vpop.f32.mrb[37].mxu1  ;;  %v1906_v49 = vpop.f32.mrb[38].mxu0 }
 0x178   :  { %v1969_v50 = vadd.f32 %v1968_v48, %v1967_v42  ;;  %v1970_v51 = vpop.f32.mrb[38].mxu1  ;;  %v1907_v52 = vpop.f32.mrb[39].mxu0 }
 0x179   :  { %1374 = vst [vmem:[#allocation8 + $0x8] sm:$0xff] %v1358_v46  ;;  %v1206_v22 = vadd.f32 %v1905_v47, %v2374_v38  ;;  %v1908_v53 = vadd.f32 %v1907_v52, %v1906_v49  ;;  %v1971_v55 = vpop.f32.mrb[39].mxu1  ;;  %v1389_v57 = vpack.c.bf16 %v1358_v46, %v1357_v10 }
 0x17a   :  { %v1972_v24 = vadd.f32 %v1971_v55, %v1970_v51 }
 0x17b   :  { %v1303_v58 = vadd.f32 %v1969_v50, %v1206_v22  ;;  %v1209_v59 = vadd.f32 %v1908_v53, %v2377_v40  ;;  %2041 = vmatprep.mubr.bf16.mxu0 %v1389_v57 }
 0x17d   :  { %v1359_v60 = vmax.f32 %v1303_v58, 0.0  ;;  %v1306_v62 = vadd.f32 %v1972_v24, %v1209_v59  ;;  %v1909_v0 = vpop.f32.mrb[40].mxu0 }
 0x17e   :  { %v1973_v1 = vpop.f32.mrb[40].mxu1  ;;  %v1910_v2 = vpop.f32.mrb[41].mxu0 }
 0x17f   :  { %1375 = vst [vmem:[#allocation8 + $0x10] sm:$0xff] %v1359_v60  ;;  %v1360_v3 = vmax.f32 %v1306_v62, 0.0  ;;  %v1911_v4 = vadd.f32 %v1910_v2, %v1909_v0  ;;  %v1974_v5 = vpop.f32.mrb[41].mxu1  ;;  %v1912_v7 = vpop.f32.mrb[42].mxu0 }
 0x180   :  { %v1975_v9 = vadd.f32 %v1974_v5, %v1973_v1  ;;  %v1976_v38 = vpop.f32.mrb[42].mxu1  ;;  %v1913_v11 = vpop.f32.mrb[43].mxu0 }
 0x181   :  { %1376 = vst [vmem:[#allocation8 + $0x18] sm:$0xff] %v1360_v3  ;;  %v1390_v12 = vpack.c.bf16 %v1360_v3, %v1359_v60  ;;  %v1214_v13 = vadd.f32 %v1911_v4, %v2380_v54  ;;  %v1914_v14 = vadd.f32 %v1913_v11, %v1912_v7  ;;  %v1977_v40 = vpop.f32.mrb[43].mxu1 }
 0x182   :  { %v1978_v15 = vadd.f32 %v1977_v40, %v1976_v38 }
 0x183   :  { %v1311_v17 = vadd.f32 %v1975_v9, %v1214_v13  ;;  %v1217_v19 = vadd.f32 %v1914_v14, %v2383_v56  ;;  %2042 = vmatmul.mubr.bf16.vlgmr.msra.gmra.mrb[64].mxu0 %v1390_v12 }
 0x185   :  { %v1361_v20 = vmax.f32 %v1311_v17, 0.0  ;;  %v1314_v21 = vadd.f32 %v1978_v15, %v1217_v19  ;;  %v1915_v23 = vpop.f32.mrb[44].mxu0 }
 0x186   :  { %v1979_v26 = vpop.f32.mrb[44].mxu1  ;;  %v1916_v28 = vpop.f32.mrb[45].mxu0 }
 0x187   :  { %1377 = vst [vmem:[#allocation8 + $0x20] sm:$0xff] %v1361_v20  ;;  %v1362_v29 = vmax.f32 %v1314_v21, 0.0  ;;  %v1917_v30 = vadd.f32 %v1916_v28, %v1915_v23  ;;  %v1980_v31 = vpop.f32.mrb[45].mxu1  ;;  %v1918_v32 = vpop.f32.mrb[46].mxu0 }
 0x188   :  { %v1981_v33 = vadd.f32 %v1980_v31, %v1979_v26  ;;  %v1982_v34 = vpop.f32.mrb[46].mxu1  ;;  %v1919_v54 = vpop.f32.mrb[47].mxu0 }
 0x189   :  { %1378 = vst [vmem:[#allocation8 + $0x28] sm:$0xff] %v1362_v29  ;;  %v1222_v35 = vadd.f32 %v1917_v30, %v2386_v6  ;;  %v1920_v36 = vadd.f32 %v1919_v54, %v1918_v32  ;;  %v1983_v37 = vpop.f32.mrb[47].mxu1  ;;  %v1391_v56 = vpack.c.bf16 %v1362_v29, %v1361_v20 }
 0x18a   :  { %v1984_v10 = vadd.f32 %v1983_v37, %v1982_v34 }
 0x18b   :  { %v1319_v39 = vadd.f32 %v1981_v33, %v1222_v35  ;;  %v1225_v41 = vadd.f32 %v1920_v36, %v2389_v8  ;;  %2045 = vmatprep.mubr.bf16.mxu0 %v1391_v56 }
 0x18d   :  { %v1363_v42 = vmax.f32 %v1319_v39, 0.0  ;;  %v1322_v44 = vadd.f32 %v1984_v10, %v1225_v41  ;;  %v1921_v46 = vpop.f32.mrb[48].mxu0 }
 0x18e   :  { %v1985_v47 = vpop.f32.mrb[48].mxu1  ;;  %v1922_v48 = vpop.f32.mrb[49].mxu0 }
 0x18f   :  { %1379 = vst [vmem:[#allocation8 + $0x30] sm:$0xff] %v1363_v42  ;;  %v1364_v49 = vmax.f32 %v1322_v44, 0.0  ;;  %v1923_v50 = vadd.f32 %v1922_v48, %v1921_v46  ;;  %v1986_v51 = vpop.f32.mrb[49].mxu1  ;;  %v1924_v52 = vpop.f32.mrb[50].mxu0 }
 0x190   :  { %v1987_v22 = vadd.f32 %v1986_v51, %v1985_v47  ;;  %v1988_v6 = vpop.f32.mrb[50].mxu1  ;;  %v1925_v53 = vpop.f32.mrb[51].mxu0 }
 0x191   :  { %1380 = vst [vmem:[#allocation8 + $0x38] sm:$0xff] %v1364_v49  ;;  %v1230_v55 = vadd.f32 %v1923_v50, %v2392_v25  ;;  %v1926_v57 = vadd.f32 %v1925_v53, %v1924_v52  ;;  %v1989_v24 = vpop.f32.mrb[51].mxu1  ;;  %v1392_v8 = vpack.c.bf16 %v1364_v49, %v1363_v42 }
 0x192   :  { %v1990_v58 = vadd.f32 %v1989_v24, %v1988_v6 }
 0x193   :  { %v1327_v59 = vadd.f32 %v1987_v22, %v1230_v55  ;;  %v1233_v60 = vadd.f32 %v1926_v57, %v2395_v27  ;;  %2046 = vmatmul.mubr.bf16.gmra.mrb[68].mxu0 %v1392_v8 }
 0x195   :  { %v1365_v62 = vmax.f32 %v1327_v59, 0.0  ;;  %v1330_v0 = vadd.f32 %v1990_v58, %v1233_v60  ;;  %v1927_v1 = vpop.f32.mrb[52].mxu0 }
 0x196   :  { %v1991_v2 = vpop.f32.mrb[52].mxu1  ;;  %v1928_v3 = vpop.f32.mrb[53].mxu0 }
 0x197   :  { %1381 = vst [vmem:[#allocation8 + $0x40] sm:$0xff] %v1365_v62  ;;  %v1366_v4 = vmax.f32 %v1330_v0, 0.0  ;;  %v1929_v5 = vadd.f32 %v1928_v3, %v1927_v1  ;;  %v1992_v7 = vpop.f32.mrb[53].mxu1  ;;  %v1930_v9 = vpop.f32.mrb[54].mxu0 }
 0x198   :  { %v1993_v38 = vadd.f32 %v1992_v7, %v1991_v2  ;;  %v1994_v25 = vpop.f32.mrb[54].mxu1  ;;  %v1931_v11 = vpop.f32.mrb[55].mxu0 }
 0x199   :  { %1382 = vst [vmem:[#allocation8 + $0x48] sm:$0xff] %v1366_v4  ;;  %v1238_v12 = vadd.f32 %v1929_v5, %v2398_v43  ;;  %v1932_v13 = vadd.f32 %v1931_v11, %v1930_v9  ;;  %v1995_v14 = vpop.f32.mrb[55].mxu1  ;;  %v1393_v27 = vpack.c.bf16 %v1366_v4, %v1365_v62 }
 0x19a   :  { %v1996_v40 = vadd.f32 %v1995_v14, %v1994_v25 }
 0x19b   :  { %v1335_v15 = vadd.f32 %v1993_v38, %v1238_v12  ;;  %v1241_v17 = vadd.f32 %v1932_v13, %v2401_v45  ;;  %2049 = vmatprep.mubr.bf16.mxu1 %v1393_v27 }
 0x19d   :  { %v1367_v19 = vmax.f32 %v1335_v15, 0.0  ;;  %v1338_v20 = vadd.f32 %v1996_v40, %v1241_v17  ;;  %v1933_v21 = vpop.f32.mrb[56].mxu0 }
 0x19e   :  { %v1997_v23 = vpop.f32.mrb[56].mxu1  ;;  %v1934_v26 = vpop.f32.mrb[57].mxu0 }
 0x19f   :  { %1383 = vst [vmem:[#allocation8 + $0x50] sm:$0xff] %v1367_v19  ;;  %v1368_v28 = vmax.f32 %v1338_v20, 0.0  ;;  %v1935_v29 = vadd.f32 %v1934_v26, %v1933_v21  ;;  %v1998_v30 = vpop.f32.mrb[57].mxu1  ;;  %v1936_v31 = vpop.f32.mrb[58].mxu0 }
 0x1a0   :  { %v1999_v32 = vadd.f32 %v1998_v30, %v1997_v23  ;;  %v2000_v43 = vpop.f32.mrb[58].mxu1  ;;  %v1937_v33 = vpop.f32.mrb[59].mxu0 }
 0x1a1   :  { %1384 = vst [vmem:[#allocation8 + $0x58] sm:$0xff] %v1368_v28  ;;  %v1394_v34 = vpack.c.bf16 %v1368_v28, %v1367_v19  ;;  %v1246_v54 = vadd.f32 %v1935_v29, %v2404_v61  ;;  %v1938_v35 = vadd.f32 %v1937_v33, %v1936_v31  ;;  %v2001_v45 = vpop.f32.mrb[59].mxu1 }
 0x1a2   :  { %v2002_v36 = vadd.f32 %v2001_v45, %v2000_v43 }
 0x1a3   :  { %v1343_v37 = vadd.f32 %v1999_v32, %v1246_v54  ;;  %v1249_v56 = vadd.f32 %v1938_v35, %v2407_v63  ;;  %2050 = vmatmul.mubr.bf16.vlgmr.msra.gmra.mrb[64].mxu1 %v1394_v34 }
 0x1a5   :  { %v1369_v10 = vmax.f32 %v1343_v37, 0.0  ;;  %v1346_v39 = vadd.f32 %v2002_v36, %v1249_v56  ;;  %v1939_v41 = vpop.f32.mrb[60].mxu0 }
 0x1a6   :  { %v2003_v42 = vpop.f32.mrb[60].mxu1  ;;  %v1940_v44 = vpop.f32.mrb[61].mxu0 }
 0x1a7   :  { %1385 = vst [vmem:[#allocation8 + $0x60] sm:$0xff] %v1369_v10  ;;  %v1370_v46 = vmax.f32 %v1346_v39, 0.0  ;;  %v1941_v47 = vadd.f32 %v1940_v44, %v1939_v41  ;;  %v2004_v48 = vpop.f32.mrb[61].mxu1  ;;  %v1942_v49 = vpop.f32.mrb[62].mxu0 }
 0x1a8   :  { %v2005_v50 = vadd.f32 %v2004_v48, %v2003_v42  ;;  %v2006_v51 = vpop.f32.mrb[62].mxu1  ;;  %v1943_v61 = vpop.f32.mrb[63].mxu0 }
 0x1a9   :  { %1386 = vst [vmem:[#allocation8 + $0x68] sm:$0xff] %v1370_v46  ;;  %v1254_v52 = vadd.f32 %v1941_v47, %v2410_v16  ;;  %v1944_v22 = vadd.f32 %v1943_v61, %v1942_v49  ;;  %v2007_v6 = vpop.f32.mrb[63].mxu1  ;;  %v1395_v63 = vpack.c.bf16 %v1370_v46, %v1369_v10 }
 0x1aa   :  { %v2008_v53 = vadd.f32 %v2007_v6, %v2006_v51 }
 0x1ab   :  { %v1351_v55 = vadd.f32 %v2005_v50, %v1254_v52  ;;  %v1257_v57 = vadd.f32 %v1944_v22, %v2413_v18  ;;  %2053 = vmatprep.mubr.bf16.mxu1 %v1395_v63 }
 0x1ad   :  { %v1371_v24 = vmax.f32 %v1351_v55, 0.0  ;;  %v1354_v8 = vadd.f32 %v2008_v53, %v1257_v57 }
 0x1af   :  { %1387 = vst [vmem:[#allocation8 + $0x70] sm:$0xff] %v1371_v24  ;;  %v1372_v58 = vmax.f32 %v1354_v8, 0.0 }
 0x1b1   :  { %1388 = vst [vmem:[#allocation8 + $0x78] sm:$0xff] %v1372_v58  ;;  %v1396_v59 = vpack.c.bf16 %v1372_v58, %v1371_v24 }
 0x1b3   :  { %2054 = vmatmul.mubr.bf16.gmra.mrb[68].mxu1 %v1396_v59 }
 0x1b4   :  { %2233 = shalt.err (!%p2230_p0)
}
 0x1b5   :  { %s2234_s16 = scalar_lea.hbm %s2469_s5, 2048 }
 0x1b6   :  { %p2235_p1 = scmp.ne.s32.totalorder %s2469_s5, %s2234_s16  ;;  %p2238_p2 = scmp.lt.u32.totalorder %s2234_s16, %s2469_s5 }
 0x1b8   :  { %p2240_p3 = pnand %p2238_p2, %p2235_p1 }
 0x1ba   :  { %2243 = shalt.err (!%p2240_p3)
}
 0x1bb   :  { %s2282_s1 = smov 128   ;;  %s2283_s21 = smov 8   ;;  %v1744_v16 = vld [vmem:[%s2468_s4] ss:$0 sm:$0xff] }
 0x1bc   :  { %1592 = dma.vmem_to_hbm [thread:$0]  %s1587_s8, 2048, %s2469_s5, [#allocation4], %s2282_s1, %s2282_s1, %s2283_s21  }
 0x1bd   :  { %s2284_s4 = smov [#allocation9]  }
 0x1be   :  { %s1598_s5 = sshll.u32 %s2284_s4, 4  ;;  %s1599_s5 = int_to_ptr.vmem [resolvable:$true] %s1598_s5 }
 0x1bf   :  { %s2244_s26 = scalar_lea.vmem %s1599_s5, 2048  ;;  %p2249_p5 = scmp.lt.s32.totalorder %s1599_s5, %s1599_s5 }
 0x1c0   :  { %p2245_p4 = scmp.ne.s32.totalorder %s1599_s5, %s2244_s26  ;;  %p2250_p6 = scmp.lt.s32.totalorder %s2244_s26, %s2244_s26 }
 0x1c2   :  { %p2251_p7 = por %p2250_p6, %p2249_p5 }
 0x1c4   :  { %p2252_p8 = pnand %p2251_p7, %p2245_p4 }
 0x256   :  { %v2043_v18 = vpop.f32.mrb[64].mxu0 }
 0x257   :  { %v1511_v60 = vadd.f32 %v2043_v18, %v1744_v16  ;;  %v1502_v62 = vpop.f32.mrb[65].mxu0 }
 0x258   :  { %v1503_v0 = vadd.f32 %v1744_v16, %v1502_v62  ;;  %v2044_v1 = vpop.f32.mrb[66].mxu0 }
 0x259   :  { %1567 = vst [vmem:[#allocation9 + $0x10] sm:$0xff] %v1511_v60  ;;  %v1514_v2 = vadd.f32 %v2044_v1, %v1744_v16  ;;  %v1505_v3 = vpop.f32.mrb[67].mxu0 }
 0x25a   :  { %1565 = vst [vmem:[#allocation9] sm:$0xff] %v1503_v0  ;;  %v1506_v4 = vadd.f32 %v1744_v16, %v1505_v3 }
 0x25b   :  { %1568 = vst [vmem:[#allocation9 + $0x18] sm:$0xff] %v1514_v2 }
 0x25c   :  { %1566 = vst [vmem:[#allocation9 + $0x8] sm:$0xff] %v1506_v4 }
 0x266   :  { %v2047_v5 = vpop.f32.mrb[68].mxu0 }
 0x267   :  { %v1527_v7 = vadd.f32 %v2047_v5, %v1744_v16  ;;  %v1518_v9 = vpop.f32.mrb[69].mxu0 }
 0x268   :  { %v1519_v38 = vadd.f32 %v1744_v16, %v1518_v9  ;;  %v2048_v25 = vpop.f32.mrb[70].mxu0 }
 0x269   :  { %1571 = vst [vmem:[#allocation9 + $0x30] sm:$0xff] %v1527_v7  ;;  %v1530_v11 = vadd.f32 %v2048_v25, %v1744_v16  ;;  %v1521_v12 = vpop.f32.mrb[71].mxu0 }
 0x26a   :  { %1569 = vst [vmem:[#allocation9 + $0x20] sm:$0xff] %v1519_v38  ;;  %v1522_v13 = vadd.f32 %v1744_v16, %v1521_v12 }
 0x26b   :  { %1572 = vst [vmem:[#allocation9 + $0x38] sm:$0xff] %v1530_v11 }
 0x26c   :  { %1570 = vst [vmem:[#allocation9 + $0x28] sm:$0xff] %v1522_v13 }
 0x276   :  { %v2051_v14 = vpop.f32.mrb[64].mxu1 }
 0x277   :  { %v1543_v27 = vadd.f32 %v2051_v14, %v1744_v16  ;;  %v1534_v40 = vpop.f32.mrb[65].mxu1 }
 0x278   :  { %v1535_v15 = vadd.f32 %v1744_v16, %v1534_v40  ;;  %v2052_v17 = vpop.f32.mrb[66].mxu1 }
 0x279   :  { %1575 = vst [vmem:[#allocation9 + $0x50] sm:$0xff] %v1543_v27  ;;  %v1546_v19 = vadd.f32 %v2052_v17, %v1744_v16  ;;  %v1537_v20 = vpop.f32.mrb[67].mxu1 }
 0x27a   :  { %1573 = vst [vmem:[#allocation9 + $0x40] sm:$0xff] %v1535_v15  ;;  %v1538_v21 = vadd.f32 %v1744_v16, %v1537_v20 }
 0x27b   :  { %1576 = vst [vmem:[#allocation9 + $0x58] sm:$0xff] %v1546_v19 }
 0x27c   :  { %1574 = vst [vmem:[#allocation9 + $0x48] sm:$0xff] %v1538_v21 }
 0x286   :  { %v2055_v23 = vpop.f32.mrb[68].mxu1 }
 0x287   :  { %v1559_v26 = vadd.f32 %v2055_v23, %v1744_v16  ;;  %v1550_v28 = vpop.f32.mrb[69].mxu1 }
 0x288   :  { %v1551_v29 = vadd.f32 %v1744_v16, %v1550_v28  ;;  %v2056_v30 = vpop.f32.mrb[70].mxu1 }
 0x289   :  { %1579 = vst [vmem:[#allocation9 + $0x70] sm:$0xff] %v1559_v26  ;;  %v1562_v31 = vadd.f32 %v2056_v30, %v1744_v16  ;;  %v1553_v32 = vpop.f32.mrb[71].mxu1 }
 0x28a   :  { %1577 = vst [vmem:[#allocation9 + $0x60] sm:$0xff] %v1551_v29  ;;  %v1554_v43 = vadd.f32 %v1744_v16, %v1553_v32 }
 0x28b   :  { %1580 = vst [vmem:[#allocation9 + $0x78] sm:$0xff] %v1562_v31 }
 0x28c   :  { %1578 = vst [vmem:[#allocation9 + $0x68] sm:$0xff] %v1554_v43 }
 0x28d   :  { %2255 = shalt.err (!%p2252_p8)
}
 0x28e   :  { %s2256_s29 = scalar_lea.hbm %s2470_s6, 2048 }
 0x28f   :  { %p2257_p9 = scmp.ne.s32.totalorder %s2470_s6, %s2256_s29  ;;  %p2260_p10 = scmp.lt.u32.totalorder %s2256_s29, %s2470_s6 }
 0x291   :  { %p2262_p11 = pnand %p2260_p10, %p2257_p9 }
 0x293   :  { %2265 = shalt.err (!%p2262_p11)
}
 0x294   :  { %1604 = dma.vmem_to_hbm [thread:$0]  %s1599_s5, 2048, %s2470_s6, [#allocation10], %s2282_s1, %s2282_s1, %s2283_s21  }
 0x295   :  { %2270 = dma.done.wait [#allocation4], 2048  }
 0x296   :  { %2271 = vsyncadd [#allocation4], 4294965248 }
 0x297   :  { %2272 = dma.done.wait [#allocation10], 2048  }
 0x298   :  { %2273 = vsyncadd [#allocation10], 4294965248 }
 0x299   :  { %1611 = vsyncpa [#allocation3], 1 }
 0x29a   :  { %1612 = vsyncpa [#allocation6], 1 }
 0x29b   :  { %1613 = vsyncpa [#allocation4], 1 }
 0x29c   :  { %1614 = vsyncpa [#allocation10], 1 }

</bundles_post_ra>
